<compile_context>
chip_gen: v7x
topology: tpu7x:2x2x1
jax: 0.10.0
libtpu: 0.0.40
codegen_flags: <defaults>
</compile_context>

<pallas_src>
import numpy as np
import jax
import jax.numpy as jnp
from jax.experimental import pallas as pl
from jax.experimental.pallas import tpu as pltpu

MAX_SITES = 10
PAD_IDX = MAX_SITES * 3            # 30
NUM_EMB = MAX_SITES * 3 + 1        # 31
OUT_SIZE = 32                      # -> emb_dim = 16
EMB_DIM = OUT_SIZE // 2

_LANES = 128
_MAX_ROW_TILE = 512                # up to 4096 lookups per grid step


def _embed_kernel(idx_ref, bdtab_ref, out_ref):
    # idx_ref:   (RT, SLOTS)        int32 -- absolute block-diag column codes
    #                                        (band offset j*V already folded in)
    # bdtab_ref: (SLOTS*V, SLOTS*D) f32   -- block-diagonal embedding table (resident)
    # out_ref:   (RT, SLOTS*D=128)  f32   -- lane-dense output slab
    idx = idx_ref[...]
    _, slots = idx.shape
    kcols = bdtab_ref.shape[0]

    # Single (1, kcols) constant column iota; each slot contributes one
    # lane-broadcast compare. Bands are disjoint, so OR combines them exactly.
    col = jax.lax.broadcasted_iota(jnp.int32, (1, kcols), 1)
    hit = col == idx[:, 0:1]
    for j in range(1, slots):
        hit = jnp.logical_or(hit, col == idx[:, j:j + 1])
    onehot = hit.astype(jnp.float32)                     # (RT, kcols) block one-hot

    # (RT, 256) @ (256, 128) -> (RT, 128): MXU-native K/N, unmasked 128-lane stores.
    out_ref[...] = jnp.dot(onehot, bdtab_ref[...],
                           preferred_element_type=jnp.float32)


def make_embedding_table(key, num_emb, emb_dim, pad_idx):
    """Synthetic nn.Embedding weights with the padding row zeroed."""
    w = jax.random.normal(key, (num_emb, emb_dim), dtype=jnp.float32)
    return w.at[pad_idx].set(0.0)


def make_blockdiag_table(table):
    """One-time (outside jit) build of the lane-packed block-diagonal table.

    table: f32 [num_emb, d] with table[PAD_IDX] == 0.
    returns f32 [slots*v_pad, slots*d] = diag(table, ..., table), vocab padded
    to a multiple of 8 with zero rows.
    """
    w = np.asarray(jax.device_get(table), dtype=np.float32)
    num_emb, d = w.shape
    assert _LANES % d == 0, "emb dim must divide 128 for the lane-dense packing"
    slots = _LANES // d
    v_pad = ((num_emb + 7) // 8) * 8                     # 31 -> 32 (sublane friendly)
    bd = np.zeros((slots * v_pad, slots * d), np.float32)
    for j in range(slots):
        bd[j * v_pad:j * v_pad + num_emb, j * d:(j + 1) * d] = w
    return jnp.asarray(bd)


def embed_site_info_bidir1(x, bd_table, emb_dim=EMB_DIM):
    """x: int [..., P]; bd_table: f32 [slots*v_pad, 128] from make_blockdiag_table.

    Returns f32 [..., P*emb_dim]."""
    # Note: int64 inputs are truncated to int32 (harmless: vocab size is 31).
    x = x.astype(jnp.int32)
    lead_shape = x.shape[:-1]
    p = x.shape[-1]

    kcols, lanes = bd_table.shape
    d = emb_dim
    slots = lanes // d                                   # 8 embeddings per output row
    v_pad = kcols // slots

    n = int(np.prod(x.shape))                            # total number of lookups
    rows = -(-n // slots)
    if rows >= 2 * _MAX_ROW_TILE:
        row_tile = _MAX_ROW_TILE                         # big inputs: max tile, >=2 steps
    else:
        # small inputs: aim for ~2 grid steps (keeps both v7x TCs busy), mult of 8
        row_tile = min(_MAX_ROW_TILE, max(8, ((rows + 15) // 16) * 8))
    r_pad = ((rows + row_tile - 1) // row_tile) * row_tile
    n_pad = r_pad * slots

    flat = x.reshape(-1)
    if n_pad != n:
        # Pad with PAD_IDX -> zero rows, dropped after the kernel.
        # (Minor cost; a PrefetchScalarGridSpec + pl.when tail mask could avoid it.)
        flat = jnp.concatenate(
            [flat, jnp.full((n_pad - n,), PAD_IDX, jnp.int32)])

    # Fold the per-slot band offset into the index so the kernel compares
    # against a single static column iota (cheap host-side add on a tiny tensor).
    offs = (jnp.arange(slots, dtype=jnp.int32) * v_pad)[None, :]
    idx2d = flat.reshape(r_pad, slots) + offs

    out = pl.pallas_call(
        _embed_kernel,
        out_shape=jax.ShapeDtypeStruct((r_pad, lanes), jnp.float32),
        grid=(r_pad // row_tile,),
        in_specs=[
            pl.BlockSpec((row_tile, slots), lambda i: (i, 0)),
            pl.BlockSpec((kcols, lanes), lambda i: (0, 0)),   # VMEM-resident table
        ],
        out_specs=pl.BlockSpec((row_tile, lanes), lambda i: (i, 0)),
        compiler_params=pltpu.CompilerParams(
            dimension_semantics=("parallel",)),
    )(idx2d, bd_table)

    # Row-major (r_pad, 128) == (n_pad, 16); drop padding, fold emb dim into P.
    out_flat = out.reshape(n_pad, d)[:n]
    return out_flat.reshape(lead_shape + (p * d,))


if __name__ == "__main__":
    key = jax.random.PRNGKey(0)
    k_idx, k_w = jax.random.split(key)

    B, S, P = 2, 8, 2   # batch, seq (e.g. tree edges), pair of encoded sites
    x = jax.random.randint(k_idx, (B, S, P), 0, NUM_EMB, dtype=jnp.int32)
    # sprinkle in some PAD_IDX entries to exercise padding_idx semantics
    x = x.at[0, 0, :].set(PAD_IDX)
    x = x.at[1, 3, 1].set(PAD_IDX)

    table = make_embedding_table(k_w, NUM_EMB, EMB_DIM, PAD_IDX)   # (31, 16)
    bd = make_blockdiag_table(table)                               # (256, 128), built once

    fn = jax.jit(embed_site_info_bidir1)
    out = jax.block_until_ready(fn(x, bd))

    # reference check (plain JAX gather of the original table)
    ref = table[x.reshape(-1)].reshape(B, S, P * EMB_DIM)
    assert out.shape == (B, S, OUT_SIZE), out.shape
    assert jnp.allclose(out, ref, atol=1e-5), "mismatch vs reference"

    print("KERNEL_OK")
</pallas_src>

<mosaic_0001>
module attributes {stable_mosaic.version = 11 : i64} {
  func.func @_embed_kernel(%arg0: i32, %arg1: memref<8x8xi32, #tpu.memory_space<vmem>>, %arg2: memref<256x128xf32, #tpu.memory_space<vmem>>, %arg3: memref<8x128xf32, #tpu.memory_space<vmem>>) attributes {dimension_semantics = [#tpu.dimension_semantics<parallel>], iteration_bounds = array<i64: 1>, scalar_prefetch = 0 : i64, scratch_operands = 0 : i64, tpu.core_type = #tpu.core_type<tc>, window_params = [{transform_indices = @transform_0, window_bounds = array<i64: 8, 8>}, {pipeline_mode = #tpu.pipeline_mode<synchronous>, transform_indices = @transform_1, window_bounds = array<i64: 256, 128>}, {transform_indices = @transform_2, window_bounds = array<i64: 8, 128>}]} {
    %c0 = arith.constant 0 : index
    %c0_0 = arith.constant 0 : index
    %0 = vector.load %arg1[%c0, %c0_0] : memref<8x8xi32, #tpu.memory_space<vmem>>, vector<8x8xi32>
    %1 = tpu.iota {dimensions = array<i32: 1>} : vector<1x256xi32>
    %2 = vector.extract_strided_slice %0 {offsets = [0, 0], sizes = [8, 1], strides = [1, 1]} : vector<8x8xi32> to vector<8x1xi32>
    %3 = vector.broadcast %1 : vector<1x256xi32> to vector<8x256xi32>
    %4 = vector.broadcast %2 : vector<8x1xi32> to vector<8x256xi32>
    %5 = arith.cmpi eq, %3, %4 : vector<8x256xi32>
    %6 = vector.extract_strided_slice %0 {offsets = [0, 1], sizes = [8, 1], strides = [1, 1]} : vector<8x8xi32> to vector<8x1xi32>
    %7 = vector.broadcast %1 : vector<1x256xi32> to vector<8x256xi32>
    %8 = vector.broadcast %6 : vector<8x1xi32> to vector<8x256xi32>
    %9 = arith.cmpi eq, %7, %8 : vector<8x256xi32>
    %10 = arith.ori %5, %9 : vector<8x256xi1>
    %11 = vector.extract_strided_slice %0 {offsets = [0, 2], sizes = [8, 1], strides = [1, 1]} : vector<8x8xi32> to vector<8x1xi32>
    %12 = vector.broadcast %1 : vector<1x256xi32> to vector<8x256xi32>
    %13 = vector.broadcast %11 : vector<8x1xi32> to vector<8x256xi32>
    %14 = arith.cmpi eq, %12, %13 : vector<8x256xi32>
    %15 = arith.ori %10, %14 : vector<8x256xi1>
    %16 = vector.extract_strided_slice %0 {offsets = [0, 3], sizes = [8, 1], strides = [1, 1]} : vector<8x8xi32> to vector<8x1xi32>
    %17 = vector.broadcast %1 : vector<1x256xi32> to vector<8x256xi32>
    %18 = vector.broadcast %16 : vector<8x1xi32> to vector<8x256xi32>
    %19 = arith.cmpi eq, %17, %18 : vector<8x256xi32>
    %20 = arith.ori %15, %19 : vector<8x256xi1>
    %21 = vector.extract_strided_slice %0 {offsets = [0, 4], sizes = [8, 1], strides = [1, 1]} : vector<8x8xi32> to vector<8x1xi32>
    %22 = vector.broadcast %1 : vector<1x256xi32> to vector<8x256xi32>
    %23 = vector.broadcast %21 : vector<8x1xi32> to vector<8x256xi32>
    %24 = arith.cmpi eq, %22, %23 : vector<8x256xi32>
    %25 = arith.ori %20, %24 : vector<8x256xi1>
    %26 = vector.extract_strided_slice %0 {offsets = [0, 5], sizes = [8, 1], strides = [1, 1]} : vector<8x8xi32> to vector<8x1xi32>
    %27 = vector.broadcast %1 : vector<1x256xi32> to vector<8x256xi32>
    %28 = vector.broadcast %26 : vector<8x1xi32> to vector<8x256xi32>
    %29 = arith.cmpi eq, %27, %28 : vector<8x256xi32>
    %30 = arith.ori %25, %29 : vector<8x256xi1>
    %31 = vector.extract_strided_slice %0 {offsets = [0, 6], sizes = [8, 1], strides = [1, 1]} : vector<8x8xi32> to vector<8x1xi32>
    %32 = vector.broadcast %1 : vector<1x256xi32> to vector<8x256xi32>
    %33 = vector.broadcast %31 : vector<8x1xi32> to vector<8x256xi32>
    %34 = arith.cmpi eq, %32, %33 : vector<8x256xi32>
    %35 = arith.ori %30, %34 : vector<8x256xi1>
    %36 = vector.extract_strided_slice %0 {offsets = [0, 7], sizes = [8, 1], strides = [1, 1]} : vector<8x8xi32> to vector<8x1xi32>
    %37 = vector.broadcast %1 : vector<1x256xi32> to vector<8x256xi32>
    %38 = vector.broadcast %36 : vector<8x1xi32> to vector<8x256xi32>
    %39 = arith.cmpi eq, %37, %38 : vector<8x256xi32>
    %40 = arith.ori %35, %39 : vector<8x256xi1>
    %41 = arith.extui %40 : vector<8x256xi1> to vector<8x256xi32>
    %42 = arith.sitofp %41 : vector<8x256xi32> to vector<8x256xf32>
    %c0_1 = arith.constant 0 : index
    %c0_2 = arith.constant 0 : index
    %43 = vector.load %arg2[%c0_1, %c0_2] : memref<256x128xf32, #tpu.memory_space<vmem>>, vector<256x128xf32>
    %cst = arith.constant dense<0.000000e+00> : vector<8x128xf32>
    %44 = tpu.matmul %42, %43, %cst {dimension_numbers = #tpu.dot_dimension_numbers<[1], [0], [0], [1], [0, 0, 1, 1], [], []>} : vector<8x256xf32>, vector<256x128xf32>, vector<8x128xf32> -> vector<8x128xf32>
    %c0_3 = arith.constant 0 : index
    %c0_4 = arith.constant 0 : index
    %45 = vector.load %arg3[%c0_3, %c0_4] : memref<8x128xf32, #tpu.memory_space<vmem>>, vector<8x128xf32>
    tpu.vector_store %arg3[%c0_3, %c0_4], %44 {strides = array<i32>} : memref<8x128xf32, #tpu.memory_space<vmem>>, vector<8x128xf32>,
    return
  }
  func.func @transform_0(%arg0: i32) -> (i32, i32) {
    %c0_i32 = arith.constant 0 : i32
    %c0_i32_0 = arith.constant 0 : i32
    return %arg0, %c0_i32 : i32, i32
  }
  func.func @transform_1(%arg0: i32) -> (i32, i32) {
    %c0_i32 = arith.constant 0 : i32
    %c0_i32_0 = arith.constant 0 : i32
    %c0_i32_1 = arith.constant 0 : i32
    return %c0_i32, %c0_i32_0 : i32, i32
  }
  func.func @transform_2(%arg0: i32) -> (i32, i32) {
    %c0_i32 = arith.constant 0 : i32
    %c0_i32_0 = arith.constant 0 : i32
    return %arg0, %c0_i32 : i32, i32
  }
}

</mosaic_0001>

<bundles_post_ra>
// kernel: embed_site_info_bidir1.1
= control target key start
LH: loop header
LB: loop body
LE: loop exit
PB: predicated region body
PF: predicated region fallthrough
CT: control target
= control target key end

     0   :  { %7 = vsyncpa [#allocation3], 0  ;;  %s309_s9 = smov [#allocation2]   ;;  %s364_s0 = inlined_call_operand.vmem [shape: s32[8,8], index: 0, kind: input, shape index: {}]   ;;  %s365_s1 = inlined_call_operand.hbm [shape: f32[256,128], index: 1, kind: input, shape index: {}]   ;;  %s366_s2 = inlined_call_operand.vmem [shape: f32[8,128], index: 2, kind: output, shape index: {}]  }
   0x1   :  { %s15_s10 = sshll.u32 %s309_s9, 4  ;;  %s285_s13 = scalar_lea.hbm %s365_s1, 4096  ;;  %s16_s10 = int_to_ptr.vmem [resolvable:$true] %s15_s10 }
   0x2   :  { %p286_p0 = scmp.ne.s32.totalorder %s365_s1, %s285_s13  ;;  %p289_p1 = scmp.lt.u32.totalorder %s285_s13, %s365_s1 }
   0x4   :  { %p291_p2 = pnand %p289_p1, %p286_p0 }
   0x6   :  { %294 = shalt.err (!%p291_p2)
}
   0x7   :  { %s295_s18 = scalar_lea.vmem %s16_s10, 4096  ;;  %p300_p4 = scmp.lt.s32.totalorder %s16_s10, %s16_s10 }
   0x8   :  { %p296_p3 = scmp.ne.s32.totalorder %s16_s10, %s295_s18  ;;  %p301_p5 = scmp.lt.s32.totalorder %s295_s18, %s295_s18 }
   0xa   :  { %p302_p6 = por %p301_p5, %p300_p4 }
   0xc   :  { %p303_p7 = pnand %p302_p6, %p296_p3 }
   0xe   :  { %306 = shalt.err (!%p303_p7)
}
   0xf   :  { %s310_s19 = smov 128   ;;  %s311_s20 = smov 8  }
  0x10   :  { %21 = dma.hbm_to_vmem [thread:$0]  %s365_s1, 4096, %s16_s10, [#allocation3], %s310_s19, %s310_s19, %s311_s20  }
  0x11   :  { %307 = dma.done.wait [#allocation3], 4096  }
  0x12   :  { %308 = vsyncadd [#allocation3], 4294963200  ;;  %v312_v0 = vmov 2   ;;  %v313_v1 = vmov 0   ;;  %v351_v2 = vld [vmem:[%s364_s0] sm:$0xff]  ;;  %v104_v4 = vld [vmem:[#allocation2 + $0x88] sm:$0xff]  ;;  %v26_v57 = vlaneseq }
  0x13   :  { %278 = vset.pattern.permute.xlu1 %v312_v0  ;;  %276 = vset.pattern.permute.xlu0 %v313_v1  ;;  %v103_v3 = vld [vmem:[#allocation2 + $0x80] sm:$0xff]  ;;  %v88_v7 = vld [vmem:[#allocation2 + $0x8] sm:$0xff]  ;;  %v105_v8 = vld [vmem:[#allocation2 + $0x90] sm:$0xff]  ;;  %v314_v17 = vmov 3   ;;  %v315_v18 = vmov 1   ;;  %v316_v28 = vmov 4  }
  0x14   :  { %42 = vperm.xlu1 %278, %v351_v2   ;;  %30 = vperm.xlu0 %276, %v351_v2   ;;  %v232_v5 = vpack.c.bf16 %v104_v4, %v103_v3  ;;  %v87_v6 = vld [vmem:[#allocation2] sm:$0xff]  ;;  %v106_v10 = vld [vmem:[#allocation2 + $0x98] sm:$0xff]  ;;  %v89_v11 = vld [vmem:[#allocation2 + $0x10] sm:$0xff]  ;;  %v317_v29 = vmov 5   ;;  %v318_v38 = vmov 6   ;;  %v319_v39 = vmov 7  }
  0x15   :  { %v234_v9 = vpack.c.bf16 %v88_v7, %v87_v6  ;;  %v90_v12 = vld [vmem:[#allocation2 + $0x18] sm:$0xff]  ;;  %v236_v13 = vpack.c.bf16 %v106_v10, %v105_v8  ;;  %v107_v14 = vld [vmem:[#allocation2 + $0xa0] sm:$0xff]  ;;  %v108_v15 = vld [vmem:[#allocation2 + $0xa8] sm:$0xff]  ;;  %v27_v58 = vand.u32 127, %v26_v57  ;;  %v320_v4 = vmov 0.0  }
  0x16   :  { %233 = vmatprep.subr.bf16.mxu0 %v232_v5  ;;  %v238_v16 = vpack.c.bf16 %v90_v12, %v89_v11  ;;  %v240_v19 = vpack.c.bf16 %v108_v15, %v107_v14  ;;  %v91_v20 = vld [vmem:[#allocation2 + $0x20] sm:$0xff]  ;;  %v92_v21 = vld [vmem:[#allocation2 + $0x28] sm:$0xff]  ;;  %v109_v22 = vld [vmem:[#allocation2 + $0xb0] sm:$0xff] }
  0x17   :  { %235 = vmatpush3.bf16.msra.mxu0 %v234_v9  ;;  %v110_v23 = vld [vmem:[#allocation2 + $0xb8] sm:$0xff]  ;;  %v242_v24 = vpack.c.bf16 %v92_v21, %v91_v20  ;;  %v93_v26 = vld [vmem:[#allocation2 + $0x30] sm:$0xff]  ;;  %v111_v30 = vld [vmem:[#allocation2 + $0xc0] sm:$0xff]  ;;  %v28_v61 = vadd.s32 128, %v27_v58 }
  0x18   :  { %279 = vset.pattern.permute.xlu1 %v314_v17  ;;  %277 = vset.pattern.permute.xlu0 %v315_v18  ;;  %v244_v25 = vpack.c.bf16 %v110_v23, %v109_v22  ;;  %v94_v27 = vld [vmem:[#allocation2 + $0x38] sm:$0xff]  ;;  %v112_v31 = vld [vmem:[#allocation2 + $0xc8] sm:$0xff]  ;;  %v95_v34 = vld [vmem:[#allocation2 + $0x40] sm:$0xff] }
  0x19   :  { %49 = vperm.xlu1 %279, %v351_v2   ;;  %35 = vperm.xlu0 %277, %v351_v2   ;;  %v246_v32 = vpack.c.bf16 %v94_v27, %v93_v26  ;;  %v248_v33 = vpack.c.bf16 %v112_v31, %v111_v30  ;;  %v96_v35 = vld [vmem:[#allocation2 + $0x48] sm:$0xff]  ;;  %v113_v36 = vld [vmem:[#allocation2 + $0xd0] sm:$0xff]  ;;  %v114_v37 = vld [vmem:[#allocation2 + $0xd8] sm:$0xff] }
  0x1a   :  { %237 = vmatprep.subr.bf16.mxu0 %v236_v13  ;;  %v250_v40 = vpack.c.bf16 %v96_v35, %v95_v34  ;;  %v252_v41 = vpack.c.bf16 %v114_v37, %v113_v36  ;;  %v97_v42 = vld [vmem:[#allocation2 + $0x50] sm:$0xff]  ;;  %v98_v43 = vld [vmem:[#allocation2 + $0x58] sm:$0xff]  ;;  %v115_v44 = vld [vmem:[#allocation2 + $0xe0] sm:$0xff] }
  0x1b   :  { %239 = vmatpush3.bf16.msra.mxu0 %v238_v16  ;;  %v116_v45 = vld [vmem:[#allocation2 + $0xe8] sm:$0xff]  ;;  %v254_v46 = vpack.c.bf16 %v98_v43, %v97_v42  ;;  %v99_v48 = vld [vmem:[#allocation2 + $0x60] sm:$0xff]  ;;  %v117_v50 = vld [vmem:[#allocation2 + $0xf0] sm:$0xff] }
  0x1c   :  { %241 = vmatprep.subr.bf16.mxu0 %v240_v19  ;;  %v256_v47 = vpack.c.bf16 %v116_v45, %v115_v44  ;;  %v100_v49 = vld [vmem:[#allocation2 + $0x68] sm:$0xff]  ;;  %v118_v51 = vld [vmem:[#allocation2 + $0xf8] sm:$0xff]  ;;  %v101_v54 = vld [vmem:[#allocation2 + $0x70] sm:$0xff] }
  0x1d   :  { %280 = vset.pattern.permute.xlu1 %v316_v28  ;;  %281 = vset.pattern.permute.xlu0 %v317_v29  ;;  %v258_v52 = vpack.c.bf16 %v100_v49, %v99_v48  ;;  %v260_v53 = vpack.c.bf16 %v118_v51, %v117_v50  ;;  %v102_v55 = vld [vmem:[#allocation2 + $0x78] sm:$0xff] }
  0x1e   :  { %56 = vperm.xlu1 %280, %v351_v2   ;;  %63 = vperm.xlu0 %281, %v351_v2   ;;  %v262_v56 = vpack.c.bf16 %v102_v55, %v101_v54 }
  0x1f   :  { %243 = vmatpush3.bf16.msra.mxu0 %v242_v24 }
  0x20   :  { %245 = vmatprep.subr.bf16.mxu0 %v244_v25 }
  0x22   :  { %282 = vset.pattern.permute.xlu1 %v318_v38  ;;  %284 = vset.pattern.permute.xlu0 %v319_v39 }
  0x23   :  { %70 = vperm.xlu1 %282, %v351_v2   ;;  %247 = vmatpush3.bf16.msra.mxu0 %v246_v32 }
  0x24   :  { %249 = vmatprep.subr.bf16.mxu0 %v248_v33 }
  0x27   :  { %283 = vset.pattern.permute.xlu1 %v319_v39  ;;  %251 = vmatpush3.bf16.msra.mxu0 %v250_v40 }
  0x28   :  { %77 = vperm.xlu1 %283, %v351_v2   ;;  %253 = vmatprep.subr.bf16.mxu0 %v252_v41 }
  0x2b   :  { %255 = vmatpush3.bf16.msra.mxu0 %v254_v46 }
  0x2c   :  { %257 = vmatprep.subr.bf16.mxu0 %v256_v47 }
  0x2f   :  { %259 = vmatpush3.bf16.msra.mxu0 %v258_v52 }
  0x30   :  { %261 = vmatprep.subr.bf16.mxu0 %v260_v53 }
  0x33   :  { %263 = vmatpush3.bf16.msra.mxu0 %v262_v56 }
  0x93   :  { %v43_v59 = vpop.permute.xlu1 %42  ;;  %v31_v60 = vpop.permute.xlu0 %30 }
  0x94   :  { %vm32_vm0 = vcmp.eq.s32.totalorder %v27_v58, %v31_v60  ;;  %vm33_vm1 = vcmp.eq.s32.totalorder %v28_v61, %v31_v60  ;;  %vm44_vm6 = vcmp.eq.s32.totalorder %v27_v58, %v43_v59  ;;  %vm45_vm7 = vcmp.eq.s32.totalorder %v28_v61, %v43_v59 }
  0x98   :  { %v50_v62 = vpop.permute.xlu1 %49  ;;  %v36_v63 = vpop.permute.xlu0 %35 }
  0x99   :  { %vm37_vm2 = vcmp.eq.s32.totalorder %v27_v58, %v36_v63  ;;  %vm38_vm3 = vcmp.eq.s32.totalorder %v28_v61, %v36_v63  ;;  %vm51_vm10 = vcmp.eq.s32.totalorder %v27_v58, %v50_v62  ;;  %vm52_vm12 = vcmp.eq.s32.totalorder %v28_v61, %v50_v62 }
  0x9a   :  { %vm39_vm4 = vmor %vm32_vm0, %vm37_vm2 }
  0x9b   :  { %vm40_vm5 = vmor %vm33_vm1, %vm38_vm3 }
  0x9c   :  { %vm46_vm8 = vmor %vm39_vm4, %vm44_vm6 }
  0x9d   :  { %v57_v0 = vpop.permute.xlu1 %56  ;;  %vm47_vm9 = vmor %vm40_vm5, %vm45_vm7  ;;  %v64_v1 = vpop.permute.xlu0 %63 }
  0x9e   :  { %vm58_vm11 = vcmp.eq.s32.totalorder %v27_v58, %v57_v0  ;;  %vm59_vm13 = vcmp.eq.s32.totalorder %v28_v61, %v57_v0  ;;  %vm53_vm14 = vmor %vm46_vm8, %vm51_vm10  ;;  %vm65_vm2 = vcmp.eq.s32.totalorder %v27_v58, %v64_v1  ;;  %vm66_vm3 = vcmp.eq.s32.totalorder %v28_v61, %v64_v1 }
  0x9f   :  { %vm54_vm15 = vmor %vm47_vm9, %vm52_vm12 }
  0xa0   :  { %vm60_vm0 = vmor %vm53_vm14, %vm58_vm11 }
  0xa1   :  { %vm61_vm1 = vmor %vm54_vm15, %vm59_vm13 }
  0xa2   :  { %v71_v2 = vpop.permute.xlu1 %70  ;;  %vm67_vm6 = vmor %vm60_vm0, %vm65_vm2 }
  0xa3   :  { %vm72_vm4 = vcmp.eq.s32.totalorder %v27_v58, %v71_v2  ;;  %vm73_vm5 = vcmp.eq.s32.totalorder %v28_v61, %v71_v2  ;;  %vm68_vm7 = vmor %vm61_vm1, %vm66_vm3 }
  0xa4   :  { %vm74_vm8 = vmor %vm67_vm6, %vm72_vm4 }
  0xa5   :  { %vm75_vm12 = vmor %vm68_vm7, %vm73_vm5 }
  0xa7   :  { %v78_v3 = vpop.permute.xlu1 %77 }
  0xa8   :  { %vm79_vm10 = vcmp.eq.s32.totalorder %v27_v58, %v78_v3  ;;  %vm80_vm9 = vcmp.eq.s32.totalorder %v28_v61, %v78_v3 }
  0xa9   :  { %vm81_vm11 = vmor %vm74_vm8, %vm79_vm10 }
  0xaa   :  { %vm82_vm14 = vmor %vm75_vm12, %vm80_vm9  ;;  %v195_v5 = vsel %vm81_vm11, 1.0, %v320_v4 }
  0xab   :  { %v196_v6 = vsel %vm82_vm14, 1.0, %v320_v4 }
  0xac   :  { %183 = vmatprep.mubr.f32.mxu0 %v196_v6 }
  0xad   :  { %184 = vmatmul.mubr.f32.vlgmr.msra.gmra.mrb[0].mxu0 %v195_v5 }
 0x180   :  { %v229_v7 = vpop.f32.mrb[0].mxu0 }
 0x181   :  { %v230_v8 = vpop.f32.mrb[1].mxu0 }
 0x182   :  { %v231_v9 = vadd.f32 %v230_v8, %v229_v7 }
 0x184   :  { %189 = vst [vmem:[%s366_s2] sm:$0xff] %v231_v9 }
 0x185   :  { %194 = vsyncpa [#allocation3], 1 }

</bundles_post_ra>
